<compile_context>
chip_gen: v7x
topology: tpu7x:2x2x1
jax: 0.10.0
libtpu: 0.0.40
codegen_flags: <defaults>
</compile_context>

<pallas_src>
import functools
import math

import jax
import jax.numpy as jnp
from jax import lax
from jax.experimental import pallas as pl
from jax.experimental.pallas import tpu as pltpu


# ----------------------------------------------------------------------------
# Parameter / buffer setup (glue, plain JAX) — mirrors WeightedDDPMLoss.__init__
# ----------------------------------------------------------------------------
def compute_timestep_weights(weighting_scheme: str, max_timesteps: int) -> jnp.ndarray:
    t = jnp.arange(max_timesteps, dtype=jnp.float32)
    if weighting_scheme == "uniform":
        return jnp.ones_like(t)
    elif weighting_scheme == "snr":
        return (t / max_timesteps) ** 0.5
    elif weighting_scheme == "sqrt":
        return jnp.sqrt(t + 1.0)
    elif weighting_scheme == "linear":
        return t / max_timesteps
    else:
        return jnp.ones_like(t)


# ----------------------------------------------------------------------------
# Pallas kernel
# ----------------------------------------------------------------------------
def _wloss_kernel(*refs, loss_type: str, has_mask: bool, ragged: bool,
                  feat_len: int, tile_d: int):
    if has_mask:
        pred_ref, tgt_ref, w_ref, mask_ref, out_ref, acc_ref = refs
    else:
        pred_ref, tgt_ref, w_ref, out_ref, acc_ref = refs
        mask_ref = None

    c = pl.program_id(0)        # feature-split index (dual-TC split on v7x)
    k = pl.program_id(1)        # tile index within this split
    nk = pl.num_programs(1)

    @pl.when(k == 0)
    def _():
        acc_ref[...] = jnp.zeros_like(acc_ref)

    pred = pred_ref[...].astype(jnp.float32)
    tgt = tgt_ref[...].astype(jnp.float32)
    diff = pred - tgt

    if loss_type == "mse":
        elem = diff * diff
    elif loss_type == "l1":
        elem = jnp.abs(diff)
    elif loss_type == "huber":
        # torch.nn.functional.huber_loss default delta = 1.0
        adiff = jnp.abs(diff)
        elem = jnp.where(adiff < 1.0, 0.5 * diff * diff, adiff - 0.5)
    else:
        raise ValueError(f"Unsupported loss type: {loss_type}")

    if mask_ref is not None:
        elem = elem * mask_ref[...].astype(jnp.float32)

    if ragged:
        # Final tile extends past the true feature length; OOB lanes hold
        # undefined data — zero them before the reduction.
        gk = c * nk + k
        col = lax.broadcasted_iota(jnp.int32, elem.shape, 1) + gk * tile_d
        elem = jnp.where(col < feat_len, elem, 0.0)

    # Per-tile row-sum into a tiny (R, 1) f32 accumulator — no full-width
    # accumulator read-modify-write per vreg.
    acc_ref[...] += jnp.sum(elem, axis=1, keepdims=True)

    @pl.when(k == nk - 1)
    def _():
        # Apply per-sample timestep weight once, reduce to this split's partial.
        partial = jnp.sum(acc_ref[...] * w_ref[...])
        out_ref[...] = jnp.zeros(out_ref.shape, jnp.float32) + partial


# ----------------------------------------------------------------------------
# Wrapper — reproduces WeightedDDPMLoss.forward
# ----------------------------------------------------------------------------
def _choose_fold(B: int, D: int) -> int:
    """Largest fold so rows R = B*fold land in ~[8, 512] with lane-friendly Df."""
    max_fold = max(1, min(512 // max(B, 1), D))

    def pick(ok):
        for f in range(max_fold, 0, -1):
            if D % f == 0 and ok(f):
                return f
        return None

    f = pick(lambda f: (D // f) >= 128 and (D // f) % 128 == 0 and (B * f) % 8 == 0)
    if f is None:
        f = pick(lambda f: (D // f) >= 128 and (D // f) % 128 == 0)
    if f is None:
        f = pick(lambda f: (D // f) >= 128)
    return f if f is not None else 1


def weighted_ddpm_loss(
    predicted_noise,
    target_noise,
    timesteps,
    mask=None,
    *,
    loss_type: str = "mse",
    weighting_scheme: str = "uniform",
    max_timesteps: int = 1000,
    tile_d: int | None = None,
):
    orig_shape = tuple(predicted_noise.shape)
    B = orig_shape[0]
    D = math.prod(orig_shape[1:])
    n_total = B * D  # loss.mean() divides by the full element count
    has_mask = mask is not None

    # per-sample timestep weights (tiny gather, plain JAX glue)
    weights = compute_timestep_weights(weighting_scheme, max_timesteps)
    batch_w = weights[timesteps].astype(jnp.float32)                 # (B,)

    # --- sublane folding (free view; rows of one sample stay contiguous) ----
    fold = _choose_fold(B, D)
    R = B * fold
    Df = D // fold

    pred2 = predicted_noise.reshape(R, Df)        # native dtype, no HBM copy
    tgt2 = target_noise.reshape(R, Df)
    w2 = jnp.repeat(batch_w, fold).reshape(R, 1)  # (R, 1)

    if has_mask:
        mask_arr = mask
        if tuple(mask_arr.shape) != orig_shape:
            # TODO(synk): broadcast genuinely-broadcastable masks in-kernel
            # instead of materializing them in HBM.
            mask_arr = jnp.broadcast_to(mask_arr, orig_shape)
        if mask_arr.dtype == jnp.bool_:
            mask_arr = mask_arr.astype(jnp.bfloat16)   # narrow, well-supported stream
        mask2 = mask_arr.reshape(R, Df)

    # --- generation-aware VMEM budget & tile sizing --------------------------
    try:
        info = pltpu.get_tpu_info()
        vmem_cap = int(getattr(info, "vmem_capacity_bytes", 64 * 1024 * 1024))
    except Exception:
        vmem_cap = 64 * 1024 * 1024
    # streams (double-buffered) budget: ~32 MiB on v7x (64 MiB VMEM), ~64 MiB on v5e/v6e
    stream_budget = min(vmem_cap // 2, 64 * 1024 * 1024)
    vmem_limit = min((vmem_cap * 3) // 4, 96 * 1024 * 1024)

    stream_itemsize = (jnp.dtype(pred2.dtype).itemsize
                       + jnp.dtype(tgt2.dtype).itemsize
                       + (jnp.dtype(mask2.dtype).itemsize if has_mask else 0))
    # accumulator + weights + output blocks (all tiny, but counted)
    fixed_bytes = R * 4 + 2 * R * 4 + 2 * 2 * 8 * 128 * 4

    if tile_d is None:
        avail = max(stream_budget - fixed_bytes, 2 * R * stream_itemsize * 128)
        tile_d = (avail // (2 * R * stream_itemsize)) // 128 * 128
        tile_d = max(128, tile_d)

    if tile_d >= Df:
        tile_d = Df          # single full-extent block (always legal)
        num_tiles = 1
        ragged = False
    else:
        num_tiles = -(-Df // tile_d)                 # cdiv
        ragged = (num_tiles * tile_d != Df)          # in-kernel mask handles the tail

    # v7x dual-TensorCore split on the leading "parallel" axis; no-op elsewhere.
    nsplit = 2 if (num_tiles >= 2 and num_tiles % 2 == 0) else 1
    tiles_per_split = num_tiles // nsplit

    kernel = functools.partial(
        _wloss_kernel, loss_type=loss_type.lower(), has_mask=has_mask,
        ragged=ragged, feat_len=Df, tile_d=tile_d)

    stream_map = lambda c, k, T=tiles_per_split: (0, c * T + k)
    in_specs = [
        pl.BlockSpec((R, tile_d), stream_map),       # predicted_noise
        pl.BlockSpec((R, tile_d), stream_map),       # target_noise
        pl.BlockSpec((R, 1), lambda c, k: (0, 0)),   # per-row weights (fetched once)
    ]
    args = [pred2, tgt2, w2]
    if has_mask:
        in_specs.append(pl.BlockSpec((R, tile_d), stream_map))
        args.append(mask2)

    out = pl.pallas_call(
        kernel,
        out_shape=jax.ShapeDtypeStruct((nsplit, 8, 128), jnp.float32),
        grid_spec=pltpu.PrefetchScalarGridSpec(
            num_scalar_prefetch=0,
            grid=(nsplit, tiles_per_split),
            in_specs=in_specs,
            out_specs=pl.BlockSpec((1, 8, 128), lambda c, k: (c, 0, 0)),
            scratch_shapes=[pltpu.VMEM((R, 1), jnp.float32)],
        ),
        compiler_params=pltpu.CompilerParams(
            dimension_semantics=("parallel", "arbitrary"),
            vmem_limit_bytes=int(vmem_limit),
        ),
    )(*args)

    total = jnp.sum(out[:, 0, 0])
    return total / jnp.float32(n_total)


# ----------------------------------------------------------------------------
# Pure-JAX reference for a correctness sanity check
# ----------------------------------------------------------------------------
def _ref_loss(pred, tgt, timesteps, mask=None, *, loss_type="mse",
              weighting_scheme="uniform", max_timesteps=1000):
    diff = pred.astype(jnp.float32) - tgt.astype(jnp.float32)
    if loss_type == "mse":
        elem = diff * diff
    elif loss_type == "l1":
        elem = jnp.abs(diff)
    else:  # huber, delta = 1.0
        adiff = jnp.abs(diff)
        elem = jnp.where(adiff < 1.0, 0.5 * diff * diff, adiff - 0.5)
    w = compute_timestep_weights(weighting_scheme, max_timesteps)[timesteps]
    w = w.reshape((-1,) + (1,) * (elem.ndim - 1))
    elem = elem * w
    if mask is not None:
        elem = elem * mask.astype(jnp.float32)
    return jnp.mean(elem)


if __name__ == "__main__":
    key = jax.random.PRNGKey(0)
    k1, k2, k3, k4, k5, k6 = jax.random.split(key, 6)

    B, C, H, W = 2, 4, 16, 16
    predicted_noise = jax.random.normal(k1, (B, C, H, W), dtype=jnp.float32)
    target_noise = jax.random.normal(k2, (B, C, H, W), dtype=jnp.float32)
    timesteps = jax.random.randint(k3, (B,), 0, 1000)

    # --- no-mask path (2-input streaming variant, single tile) --------------
    out = weighted_ddpm_loss(
        predicted_noise, target_noise, timesteps, mask=None,
        loss_type="mse", weighting_scheme="snr", max_timesteps=1000,
    )
    out = jax.block_until_ready(out)
    ref = _ref_loss(
        predicted_noise, target_noise, timesteps, mask=None,
        loss_type="mse", weighting_scheme="snr", max_timesteps=1000,
    )
    assert jnp.allclose(out, ref, rtol=1e-5, atol=1e-6), (out, ref)

    # --- masked path (3-input streaming variant, huber) ---------------------
    mask = (jax.random.uniform(k4, (B, C, H, W)) > 0.5).astype(jnp.float32)
    out_m = weighted_ddpm_loss(
        predicted_noise, target_noise, timesteps, mask=mask,
        loss_type="huber", weighting_scheme="sqrt", max_timesteps=1000,
    )
    out_m = jax.block_until_ready(out_m)
    ref_m = _ref_loss(
        predicted_noise, target_noise, timesteps, mask=mask,
        loss_type="huber", weighting_scheme="sqrt", max_timesteps=1000,
    )
    assert jnp.allclose(out_m, ref_m, rtol=1e-5, atol=1e-6), (out_m, ref_m)

    # --- multi-tile / ragged-tail / 2-way split path (l1, bf16 streams) -----
    pred3 = jax.random.normal(k5, (2, 5, 10, 10), dtype=jnp.float32).astype(jnp.bfloat16)
    tgt3 = jax.random.normal(k6, (2, 5, 10, 10), dtype=jnp.float32).astype(jnp.bfloat16)
    ts3 = jax.random.randint(k3, (2,), 0, 1000)
    out_r = weighted_ddpm_loss(
        pred3, tgt3, ts3, mask=None,
        loss_type="l1", weighting_scheme="linear", max_timesteps=1000,
        tile_d=128,   # forces 2 ragged feature tiles -> exercises split + tail mask
    )
    out_r = jax.block_until_ready(out_r)
    ref_r = _ref_loss(
        pred3, tgt3, ts3, mask=None,
        loss_type="l1", weighting_scheme="linear", max_timesteps=1000,
    )
    assert jnp.allclose(out_r, ref_r, rtol=1e-5, atol=1e-6), (out_r, ref_r)

    print("KERNEL_OK")
</pallas_src>

<mosaic_0001>
module attributes {stable_mosaic.version = 11 : i64} {
  func.func @_wloss_kernel(%arg0: i32, %arg1: i32, %arg2: memref<16x128xf32, #tpu.memory_space<vmem>>, %arg3: memref<16x128xf32, #tpu.memory_space<vmem>>, %arg4: memref<16x1xf32, #tpu.memory_space<vmem>>, %arg5: memref<1x8x128xf32, #tpu.memory_space<vmem>>, %arg6: memref<16x1xf32, #tpu.memory_space<vmem>>) attributes {dimension_semantics = [#tpu.dimension_semantics<parallel>, #tpu.dimension_semantics<arbitrary>], iteration_bounds = array<i64: 1, 1>, scalar_prefetch = 0 : i64, scratch_operands = 1 : i64, tpu.core_type = #tpu.core_type<tc>, window_params = [{transform_indices = @transform_0, window_bounds = array<i64: 16, 128>}, {transform_indices = @transform_1, window_bounds = array<i64: 16, 128>}, {pipeline_mode = #tpu.pipeline_mode<synchronous>, transform_indices = @transform_2, window_bounds = array<i64: 16, 1>}, {transform_indices = @transform_3, window_bounds = array<i64: 1, 8, 128>}]} {
    %c0_i32 = arith.constant 0 : i32
    %0 = arith.cmpi eq, %arg1, %c0_i32 : i32
    %1 = arith.extui %0 : i1 to i32
    %c0_i32_0 = arith.constant 0 : i32
    %2 = arith.cmpi ne, %1, %c0_i32_0 : i32
    scf.if %2 {
      %cst_10 = arith.constant 0.000000e+00 : f32
      %15 = vector.broadcast %cst_10 : f32 to vector<16x1xf32>
      %c0_11 = arith.constant 0 : index
      %c0_12 = arith.constant 0 : index
      %16 = vector.load %arg6[%c0_11, %c0_12] : memref<16x1xf32, #tpu.memory_space<vmem>>, vector<16x1xf32>
      tpu.vector_store %arg6[%c0_11, %c0_12], %15 {strides = array<i32>} : memref<16x1xf32, #tpu.memory_space<vmem>>, vector<16x1xf32>,
    } else {
    }
    %c0 = arith.constant 0 : index
    %c0_1 = arith.constant 0 : index
    %3 = vector.load %arg2[%c0, %c0_1] : memref<16x128xf32, #tpu.memory_space<vmem>>, vector<16x128xf32>
    %c0_2 = arith.constant 0 : index
    %c0_3 = arith.constant 0 : index
    %4 = vector.load %arg3[%c0_2, %c0_3] : memref<16x128xf32, #tpu.memory_space<vmem>>, vector<16x128xf32>
    %5 = arith.subf %3, %4 : vector<16x128xf32>
    %6 = arith.mulf %5, %5 : vector<16x128xf32>
    %c0_4 = arith.constant 0 : index
    %c0_5 = arith.constant 0 : index
    %7 = vector.load %arg6[%c0_4, %c0_5] : memref<16x1xf32, #tpu.memory_space<vmem>>, vector<16x1xf32>
    %cst = arith.constant dense<0.000000e+00> : vector<16xf32>
    %8 = vector.multi_reduction <add>, %6, %cst [1] : vector<16x128xf32> to vector<16xf32>
    %9 = vector.shape_cast %8 : vector<16xf32> to vector<16x1xf32>
    %10 = arith.addf %7, %9 : vector<16x1xf32>
    %c0_6 = arith.constant 0 : index
    %c0_7 = arith.constant 0 : index
    %11 = vector.load %arg6[%c0_6, %c0_7] : memref<16x1xf32, #tpu.memory_space<vmem>>, vector<16x1xf32>
    tpu.vector_store %arg6[%c0_6, %c0_7], %10 {strides = array<i32>} : memref<16x1xf32, #tpu.memory_space<vmem>>, vector<16x1xf32>,
    %c0_i32_8 = arith.constant 0 : i32
    %12 = arith.cmpi eq, %arg1, %c0_i32_8 : i32
    %13 = arith.extui %12 : i1 to i32
    %c0_i32_9 = arith.constant 0 : i32
    %14 = arith.cmpi ne, %13, %c0_i32_9 : i32
    scf.if %14 {
      %c0_10 = arith.constant 0 : index
      %c0_11 = arith.constant 0 : index
      %15 = vector.load %arg6[%c0_10, %c0_11] : memref<16x1xf32, #tpu.memory_space<vmem>>, vector<16x1xf32>
      %c0_12 = arith.constant 0 : index
      %c0_13 = arith.constant 0 : index
      %16 = vector.load %arg4[%c0_12, %c0_13] : memref<16x1xf32, #tpu.memory_space<vmem>>, vector<16x1xf32>
      %17 = arith.mulf %15, %16 : vector<16x1xf32>
      %18 = vector.shape_cast %17 : vector<16x1xf32> to vector<1x16x1xf32>
      %cst_14 = arith.constant dense<0.000000e+00> : vector<1xf32>
      %19 = vector.multi_reduction <add>, %18, %cst_14 [1, 2] : vector<1x16x1xf32> to vector<1xf32>
      %20 = vector.shape_cast %19 : vector<1xf32> to vector<1x1x1xf32>
      %21 = vector.extract %20[0, 0, 0] : f32 from vector<1x1x1xf32>
      %cst_15 = arith.constant 0.000000e+00 : f32
      %22 = vector.broadcast %cst_15 : f32 to vector<1x8x128xf32>
      %23 = vector.broadcast %21 : f32 to vector<1x8x128xf32>
      %24 = arith.addf %22, %23 : vector<1x8x128xf32>
      %c0_16 = arith.constant 0 : index
      %c0_17 = arith.constant 0 : index
      %c0_18 = arith.constant 0 : index
      %25 = vector.load %arg5[%c0_16, %c0_17, %c0_18] : memref<1x8x128xf32, #tpu.memory_space<vmem>>, vector<1x8x128xf32>
      tpu.vector_store %arg5[%c0_16, %c0_17, %c0_18], %24 {strides = array<i32>} : memref<1x8x128xf32, #tpu.memory_space<vmem>>, vector<1x8x128xf32>,
    } else {
    }
    return
  }
  func.func @transform_0(%arg0: i32, %arg1: i32) -> (i32, i32) {
    %c1_i32 = arith.constant 1 : i32
    %0 = arith.muli %arg0, %c1_i32 : i32
    %1 = arith.addi %0, %arg1 : i32
    %c0_i32 = arith.constant 0 : i32
    %c0_i32_0 = arith.constant 0 : i32
    return %c0_i32, %1 : i32, i32
  }
  func.func @transform_1(%arg0: i32, %arg1: i32) -> (i32, i32) {
    %c1_i32 = arith.constant 1 : i32
    %0 = arith.muli %arg0, %c1_i32 : i32
    %1 = arith.addi %0, %arg1 : i32
    %c0_i32 = arith.constant 0 : i32
    %c0_i32_0 = arith.constant 0 : i32
    return %c0_i32, %1 : i32, i32
  }
  func.func @transform_2(%arg0: i32, %arg1: i32) -> (i32, i32) {
    %c0_i32 = arith.constant 0 : i32
    %c0_i32_0 = arith.constant 0 : i32
    %c0_i32_1 = arith.constant 0 : i32
    return %c0_i32, %c0_i32_0 : i32, i32
  }
  func.func @transform_3(%arg0: i32, %arg1: i32) -> (i32, i32, i32) {
    %c0_i32 = arith.constant 0 : i32
    %c0_i32_0 = arith.constant 0 : i32
    %c0_i32_1 = arith.constant 0 : i32
    return %arg0, %c0_i32, %c0_i32_0 : i32, i32, i32
  }
}

</mosaic_0001>

<bundles_post_ra>
// kernel: tpu_custom_call.1
= control target key start
LH: loop header
LB: loop body
LE: loop exit
PB: predicated region body
PF: predicated region fallthrough
CT: control target
= control target key end

     0   :  { %8 = vsyncpa [#allocation4], 0  ;;  %s243_s0 = inlined_call_operand.vmem [shape: f32[16,128], index: 0, kind: input, shape index: {}]   ;;  %s244_s1 = inlined_call_operand.hbm [shape: f32[16,128], index: 1, kind: input, shape index: {}]   ;;  %s245_s2 = inlined_call_operand.vmem [shape: f32[16,1], index: 2, kind: input, shape index: {}]   ;;  %s246_s3 = inlined_call_operand.hbm [shape: f32[1,8,128], index: 3, kind: output, shape index: {}]  }
   0x1   :  { %9 = vsyncpa [#allocation5], 0  ;;  %s176_s12 = smov [#allocation3]   ;;  %s128_s16 = scalar_lea.hbm %s244_s1, 256 }
   0x2   :  { %s26_s13 = sshll.u32 %s176_s12, 4  ;;  %p129_p0 = scmp.ne.s32.totalorder %s244_s1, %s128_s16  ;;  %s27_s13 = int_to_ptr.vmem [resolvable:$true] %s26_s13 }
   0x3   :  { %p132_p1 = scmp.lt.u32.totalorder %s128_s16, %s244_s1 }
   0x5   :  { %p134_p2 = pnand %p132_p1, %p129_p0 }
   0x7   :  { %137 = shalt.err (!%p134_p2)
}
   0x8   :  { %s138_s21 = scalar_lea.vmem %s27_s13, 256  ;;  %p143_p4 = scmp.lt.s32.totalorder %s27_s13, %s27_s13 }
   0x9   :  { %p139_p3 = scmp.ne.s32.totalorder %s27_s13, %s138_s21  ;;  %p144_p5 = scmp.lt.s32.totalorder %s138_s21, %s138_s21 }
   0xb   :  { %p145_p6 = por %p144_p5, %p143_p4 }
   0xd   :  { %p146_p7 = pnand %p145_p6, %p139_p3 }
   0xf   :  { %149 = shalt.err (!%p146_p7)
}
  0x10   :  { %s177_s22 = smov 128   ;;  %s178_s23 = smov 8  }
  0x11   :  { %32 = dma.hbm_to_vmem [thread:$0]  %s244_s1, 256, %s27_s13, [#allocation4], %s177_s22, %s177_s22, %s178_s23  }
  0x12   :  { %172 = dma.done.wait [#allocation4], 256  }
  0x13   :  { %173 = vsyncadd [#allocation4], 4294967040  ;;  %vm54_vm0 = vcmask 7168   ;;  %v179_v0 = vmov 0.0   ;;  %v57_v1 = vld [vmem:[%s243_s0] sm:$0xff]  ;;  %v59_v2 = vld [vmem:[#allocation3] sm:$0xff] }
  0x14   :  { %55 = vst.msk [vmem:[#allocation2] sm:$0xff] %vm54_vm0, %v179_v0  ;;  %56 = vst.msk [vmem:[#allocation2 + $0x8] sm:$0xff] %vm54_vm0, %v179_v0  ;;  %v58_v3 = vld [vmem:[%s243_s0 + $0x8] sm:$0xff]  ;;  %v61_v4 = vsub.f32 %v57_v1, %v59_v2  ;;  %v60_v5 = vld [vmem:[#allocation3 + $0x8] sm:$0xff]  ;;  %s180_s5 = smov [#allocation6]  }
  0x15   :  { %v62_v6 = vsub.f32 %v58_v3, %v60_v5  ;;  %v81_v16 = vld [vmem:[%s245_s2] sm:$0xff]  ;;  %v82_v17 = vld [vmem:[%s245_s2 + $0x8] sm:$0xff]  ;;  %s106_s6 = sshll.u32 %s180_s5, 4  ;;  %s107_s6 = int_to_ptr.vmem [resolvable:$true] %s106_s6 }
  0x16   :  { %v63_v7 = vmul.f32 %v61_v4, %v61_v4  ;;  %s150_s7 = scalar_lea.vmem %s107_s6, 128  ;;  %p155_p9 = scmp.lt.s32.totalorder %s107_s6, %s107_s6 }
  0x17   :  { %v64_v8 = vmul.f32 %v62_v6, %v62_v6  ;;  %p151_p8 = scmp.ne.s32.totalorder %s107_s6, %s150_s7  ;;  %p156_p10 = scmp.lt.s32.totalorder %s150_s7, %s150_s7 }
  0x18   :  { %67 = vadd.xlane.f32.xlu0 %v63_v7 }
  0x19   :  { %p157_p11 = por %p156_p10, %p155_p9 }
  0x1b   :  { %v65_v9 = vld [vmem:[#allocation2] sm:$0xff]  ;;  %v66_v12 = vld [vmem:[#allocation2 + $0x8] sm:$0xff]  ;;  %p158_p12 = pnand %p157_p11, %p151_p8 }
  0x1c   :  { %69 = vadd.xlane.f32.xlu0 %v64_v8 }
  0xa5   :  { %v68_v10 = vpop.xlane.xlu0 %67 }
  0xa6   :  { %v71_v11 = vadd.f32 %v68_v10, %v65_v9 }
  0xa8   :  { %74 = vst.msk [vmem:[#allocation2] sm:$0xff] %vm54_vm0, %v71_v11 }
  0xa9   :  { %v70_v13 = vpop.xlane.xlu0 %69 }
  0xaa   :  { %v72_v14 = vadd.f32 %v70_v13, %v66_v12 }
  0xac   :  { %75 = vst.msk [vmem:[#allocation2 + $0x8] sm:$0xff] %vm54_vm0, %v72_v14 }
  0xaf   :  { %v79_v15 = vld [vmem:[#allocation2] sm:$0xff] }
  0xb0   :  { %v83_v18 = vmul.f32 %v81_v16, %v79_v15 }
  0xb2   :  { %v85_v21 = vsel %vm54_vm0, %v83_v18, 0.0 }
  0xb3   :  { %v80_v19 = vld [vmem:[#allocation2 + $0x8] sm:$0xff] }
  0xb4   :  { %v84_v20 = vmul.f32 %v82_v17, %v80_v19 }
  0xb6   :  { %v86_v22 = vsel %vm54_vm0, %v84_v20, 0.0 }
  0xb7   :  { %v87_v23 = vadd.f32 %v86_v22, %v85_v21 }
  0xb9   :  { %88 = vadd.xlane.f32.xlu1 %v87_v23 }
 0x146   :  { %v89_v24 = vpop.xlane.xlu1 %88 }
 0x147   :  { %v90_v25 = vrot.slane %v89_v24, 4 }
 0x149   :  { %v91_v26 = vadd.f32 %v90_v25, %v89_v24 }
 0x14b   :  { %v92_v27 = vrot.slane %v91_v26, 2 }
 0x14d   :  { %v93_v28 = vadd.f32 %v92_v27, %v91_v26 }
 0x14f   :  { %v94_v29 = vrot.slane %v93_v28, 1 }
 0x151   :  { %v95_v30 = vadd.f32 %v94_v29, %v93_v28 }
 0x153   :  { %121 = vpush %v95_v30 }
 0x184   :  { %s122_s2 = spop %121 }
 0x185   :  { %v97_v31 = vstv %s122_s2 }
 0x186   :  { %99 = vst [vmem:[#allocation6] sm:$0xff] %v97_v31 }
 0x187   :  { %161 = shalt.err (!%p158_p12)
}
 0x188   :  { %s162_s10 = scalar_lea.hbm %s246_s3, 128 }
 0x189   :  { %p163_p13 = scmp.ne.s32.totalorder %s246_s3, %s162_s10  ;;  %p166_p0 = scmp.lt.u32.totalorder %s162_s10, %s246_s3 }
 0x18b   :  { %p168_p1 = pnand %p166_p0, %p163_p13 }
 0x18d   :  { %171 = shalt.err (!%p168_p1)
}
 0x18e   :  { %109 = dma.vmem_to_hbm [thread:$0]  %s107_s6, 128, %s246_s3, [#allocation5]  }
 0x18f   :  { %174 = dma.done.wait [#allocation5], 128  }
 0x190   :  { %175 = vsyncadd [#allocation5], 4294967168 }
 0x191   :  { %113 = vsyncpa [#allocation4], 1 }
 0x192   :  { %114 = vsyncpa [#allocation5], 1 }

</bundles_post_ra>
